<compile_context>
chip_gen: v6e
topology: v6e:2x2x1
jax: 0.10.0
libtpu: 0.0.40
codegen_flags: <defaults>
</compile_context>

<pallas_src>
import numpy as np
import jax
import jax.numpy as jnp
from jax import lax
from jax.experimental import pallas as pl
from jax.experimental.pallas import tpu as pltpu


def _round_up(x, m):
    return ((x + m - 1) // m) * m


# ---------------------------------------------------------------------------
# One-time parameter preparation (hoisted out of the per-call forward).
# ---------------------------------------------------------------------------

def prepare_word_embedding_params(emb_table, proj_weight, emb_scale_value,
                                  *, proj_table_dtype=jnp.bfloat16):
    """Kernel-ready params.  Pads d_embed/d_proj to multiples of 128 (lane
    dense), folds emb_scale into the weight (proj) or the table (no-proj), and
    stores the table in bf16 on the projection path (halves gather bytes)."""
    emb_table = jnp.asarray(emb_table, dtype=jnp.float32)
    n_token, d_embed = emb_table.shape
    d_embed_pad = _round_up(d_embed, 128)

    if proj_weight is not None:
        proj_weight = jnp.asarray(proj_weight, dtype=jnp.float32)
        d_proj = proj_weight.shape[0]
        d_proj_pad = _round_up(d_proj, 128)
        table = jnp.zeros((n_token, d_embed_pad), proj_table_dtype)
        table = table.at[:, :d_embed].set(emb_table.astype(proj_table_dtype))
        weight = jnp.zeros((d_embed_pad, d_proj_pad), jnp.bfloat16)
        weight = weight.at[:d_embed, :d_proj].set(
            (proj_weight.T * jnp.float32(emb_scale_value)).astype(jnp.bfloat16))
    else:
        d_proj = d_embed
        table = jnp.zeros((n_token, d_embed_pad), jnp.float32)
        table = table.at[:, :d_embed].set(emb_table * jnp.float32(emb_scale_value))
        weight = None

    return {"table": table, "weight": weight,
            "n_token": n_token, "d_embed": d_embed, "d_proj": d_proj}


# ---------------------------------------------------------------------------
# Kernel bodies
# ---------------------------------------------------------------------------

def _vmem_onehot_proj_kernel(tok_ref, table_ref, w_ref, out_ref):
    """Small-vocab fast path (projection branch).

    Whole (padded, bf16) table is VMEM-resident via a constant-index
    BlockSpec; rows are gathered with an exact one-hot MXU matmul (0/1 x bf16
    products and zero additions are exact in f32), then projected by the
    scale-folded bf16 weight.  No per-row HBM DMAs."""
    n_token = table_ref.shape[0]
    block_n = out_ref.shape[0]
    tok = tok_ref[...]                                              # (block_n, 1) i32
    col = lax.broadcasted_iota(jnp.int32, (block_n, n_token), 1)
    onehot = (tok == col).astype(table_ref.dtype)
    emb = jnp.dot(onehot, table_ref[...], preferred_element_type=jnp.float32)
    res = jnp.dot(emb.astype(w_ref.dtype), w_ref[...],
                  preferred_element_type=jnp.float32)
    out_ref[...] = res.astype(out_ref.dtype)


def _make_hbm_gather_kernel(with_proj):
    """Large-vocab path: table stays in HBM (memory_space=ANY); token ids are
    scalar-prefetched into SMEM and drive per-row DMA gathers into a
    double-buffered VMEM scratch.  Each grid step handles block_n tokens in
    n_chunks chunks: the gather of chunk c+1 overlaps the matmul/store of
    chunk c.  Grid steps are independent -> "parallel" (megacore safe)."""

    def kernel(tok_ref, table_hbm, *rest):
        if with_proj:
            w_ref, out_ref, rows, sem = rest
        else:
            out_ref, rows, sem = rest
            w_ref = None

        block_n = out_ref.shape[0]
        _, chunk, _ = rows.shape
        n_chunks = block_n // chunk
        base = pl.program_id(0) * block_n

        def start_fetch(c, slot):
            # One row DMA per token; all signal sem[slot].  Descriptor issue is
            # unrolled (groups of 8) so it co-schedules with the matmul.
            def issue(r, carry):
                tok = tok_ref[base + c * chunk + r]
                pltpu.make_async_copy(
                    table_hbm.at[pl.ds(tok, 1), :],
                    rows.at[slot, pl.ds(r, 1), :],
                    sem.at[slot],
                ).start()
                return carry
            lax.fori_loop(0, chunk, issue, 0, unroll=8)

        def wait_fetch(slot):
            # Single coalesced wait per chunk: byte count (chunk full rows into
            # rows[slot]) exactly equals the sum of the `chunk` row copies
            # issued above.  Requires chunk <= n_token and rows.dtype == table
            # dtype (both enforced by the wrapper / param prep).
            pltpu.make_async_copy(
                table_hbm.at[pl.ds(0, chunk), :],
                rows.at[slot],
                sem.at[slot],
            ).wait()

        start_fetch(0, 0)
        for c in range(n_chunks):            # static, small (typically 4)
            slot = c % 2
            if c + 1 < n_chunks:
                start_fetch(c + 1, 1 - slot)
            wait_fetch(slot)
            emb = rows[slot]                 # (chunk, d_embed_pad)
            if with_proj:
                res = jnp.dot(emb, w_ref[...], preferred_element_type=jnp.float32)
            else:
                res = emb
            out_ref[c * chunk:(c + 1) * chunk, :] = res.astype(out_ref.dtype)

    return kernel


# ---------------------------------------------------------------------------
# Forward wrapper
# ---------------------------------------------------------------------------

def word_embedding_forward(tokens, params, *, block_n=None, chunk=None,
                           out_dtype=jnp.float32,
                           fast_path_max_vocab=4096,
                           fast_path_max_table_bytes=4 * 1024 * 1024,
                           force_hbm_gather=False):
    """tokens: int array of any shape; params from prepare_word_embedding_params.
    Returns tokens.shape + (d_proj,) in out_dtype (f32 by default)."""
    table = params["table"]
    weight = params["weight"]
    d_proj = params["d_proj"]
    n_token, d_embed_pad = table.shape
    with_proj = weight is not None
    d_out_pad = weight.shape[1] if with_proj else d_embed_pad

    orig_shape = tuple(tokens.shape)
    N = 1
    for s in orig_shape:
        N *= int(s)

    # TODO(synk): nn.Embedding raises on out-of-range ids; we clamp instead so
    # the (bounds-checked) row DMAs / one-hot gather can never go OOB.
    tok_flat = jnp.clip(jnp.reshape(tokens, (N,)).astype(jnp.int32), 0, n_token - 1)

    table_bytes = int(table.size) * table.dtype.itemsize
    weight_bytes = int(weight.size) * weight.dtype.itemsize if with_proj else 0
    out_itemsize = np.dtype(out_dtype).itemsize

    use_fast = (with_proj and not force_hbm_gather
                and n_token <= fast_path_max_vocab
                and table_bytes <= fast_path_max_table_bytes)

    if use_fast:
        # -------- small-vocab fast path: VMEM-resident table, one-hot gather
        block_n = 256 if block_n is None else block_n
        block_n = max(8, min(_round_up(block_n, 8), _round_up(N, 8)))
        n_pad = _round_up(N, block_n)
        tok = tok_flat
        if n_pad != N:
            tok = jnp.concatenate([tok, jnp.zeros((n_pad - N,), jnp.int32)])
        tok2d = tok.reshape(n_pad, 1)

        out_block_bytes = block_n * d_out_pad * out_itemsize
        onehot_bytes = block_n * n_token * table.dtype.itemsize
        resident = (2 * (table_bytes + weight_bytes + out_block_bytes + block_n * 4)
                    + 2 * onehot_bytes)
        vmem_limit = int(min(48 << 20, max(16 << 20, 2 * resident + (4 << 20))))

        out = pl.pallas_call(
            _vmem_onehot_proj_kernel,
            out_shape=jax.ShapeDtypeStruct((n_pad, d_out_pad), out_dtype),
            grid_spec=pltpu.PrefetchScalarGridSpec(
                num_scalar_prefetch=0,
                grid=(n_pad // block_n,),
                in_specs=[
                    pl.BlockSpec((block_n, 1), lambda i: (i, 0)),
                    pl.BlockSpec((n_token, d_embed_pad), lambda i: (0, 0)),
                    pl.BlockSpec(tuple(weight.shape), lambda i: (0, 0)),
                ],
                out_specs=pl.BlockSpec((block_n, d_out_pad), lambda i: (i, 0)),
            ),
            compiler_params=pltpu.CompilerParams(
                dimension_semantics=("parallel",),
                vmem_limit_bytes=vmem_limit),
        )(tok2d, table, weight)

    else:
        # -------- large-vocab path: HBM table, scalar-prefetch-driven DMA gather
        assert n_token >= 8, "HBM gather path expects n_token >= 8"
        chunk = 256 if chunk is None else chunk          # v5e: pass chunk=128
        chunk = max(8, min(_round_up(chunk, 8), _round_up(N, 8),
                           (n_token // 8) * 8))
        block_n = 4 * chunk if block_n is None else block_n
        block_n = max(chunk, (min(block_n, _round_up(N, chunk)) // chunk) * chunk)
        n_pad = _round_up(N, block_n)
        tok = tok_flat
        if n_pad != N:
            tok = jnp.concatenate([tok, jnp.zeros((n_pad - N,), jnp.int32)])

        out_block_bytes = block_n * d_out_pad * out_itemsize
        rows_bytes = 2 * chunk * d_embed_pad * table.dtype.itemsize
        resident = 2 * (weight_bytes + out_block_bytes) + rows_bytes
        vmem_limit = int(min(48 << 20, max(16 << 20, 2 * resident + (4 << 20))))

        in_specs = [pl.BlockSpec(memory_space=pl.ANY)]   # table stays in HBM
        args = [table]
        if with_proj:
            # TODO(synk): on v7x, pl.Buffered(1) on this constant-index weight
            # spec would halve its VMEM footprint; left at the default here.
            in_specs.append(pl.BlockSpec(tuple(weight.shape),
                                         lambda i, toks: (0, 0)))
            args.append(weight)

        out = pl.pallas_call(
            _make_hbm_gather_kernel(with_proj),
            out_shape=jax.ShapeDtypeStruct((n_pad, d_out_pad), out_dtype),
            grid_spec=pltpu.PrefetchScalarGridSpec(
                num_scalar_prefetch=1,
                grid=(n_pad // block_n,),
                in_specs=in_specs,
                out_specs=pl.BlockSpec((block_n, d_out_pad),
                                       lambda i, toks: (i, 0)),
                scratch_shapes=[
                    pltpu.VMEM((2, chunk, d_embed_pad), table.dtype),
                    pltpu.SemaphoreType.DMA((2,)),
                ],
            ),
            compiler_params=pltpu.CompilerParams(
                dimension_semantics=("parallel",),
                vmem_limit_bytes=vmem_limit),
        )(tok, *args)

    if n_pad != N or d_out_pad != d_proj:
        out = out[:N, :d_proj]
    return out.reshape(orig_shape + (d_proj,))


# ---------------------------------------------------------------------------
# Demo / self-test
# ---------------------------------------------------------------------------

if __name__ == "__main__":
    # Shapes consistent with the module: n_token=100, d_embed=32, d_proj=16.
    n_token, d_embed, d_proj = 100, 32, 16
    batch, seq = 2, 8
    emb_scale_value = d_proj ** 0.5            # self.emb_scale = d_proj ** 0.5
    pad_idx = n_token - 1

    key = jax.random.PRNGKey(0)
    k_emb, k_proj, k_tok = jax.random.split(key, 3)
    emb_table = jax.random.normal(k_emb, (n_token, d_embed), dtype=jnp.float32)
    emb_table = emb_table.at[pad_idx].set(0.0)           # padding_idx row zero
    bound = 1.0 / (d_embed ** 0.5)
    proj_weight = jax.random.uniform(k_proj, (d_proj, d_embed), jnp.float32,
                                     -bound, bound)

    tokens = jax.random.randint(k_tok, (batch, seq), 0, n_token, dtype=jnp.int32)
    tokens = tokens.at[0, -1].set(pad_idx)               # exercise padding row

    params = prepare_word_embedding_params(emb_table, proj_weight, emb_scale_value)

    # (1) Small-vocab fast path (whole table resident in VMEM).
    out = jax.block_until_ready(word_embedding_forward(tokens, params))
    assert out.shape == (batch, seq, d_proj)

    tok_np = np.asarray(tokens)
    # bf16-emulated reference (matches kernel precision: bf16 operands, f32 acc,
    # scale folded into the weight).
    tbl_bf = np.asarray(emb_table.astype(jnp.bfloat16).astype(jnp.float32))
    w_bf = np.asarray((proj_weight.T * emb_scale_value)
                      .astype(jnp.bfloat16).astype(jnp.float32))
    ref_bf = tbl_bf[tok_np] @ w_bf
    np.testing.assert_allclose(np.asarray(out), ref_bf, atol=2e-3, rtol=2e-3)
    # Full-precision module reference (loose: bf16 operands in the kernel).
    ref = np.asarray(emb_table)[tok_np] @ np.asarray(proj_weight).T * emb_scale_value
    np.testing.assert_allclose(np.asarray(out), ref, atol=1e-1, rtol=1e-1)
    # Padding token row stays exactly zero after lookup / proj / scale.
    assert np.all(np.asarray(out)[0, -1] == 0.0)

    # (2) Forced large-vocab path (HBM DMA gather, coalesced waits) -> same result.
    out_hbm = jax.block_until_ready(
        word_embedding_forward(tokens, params, force_hbm_gather=True,
                               block_n=32, chunk=8))
    np.testing.assert_allclose(np.asarray(out_hbm), np.asarray(out),
                               atol=1e-5, rtol=1e-5)

    # (3) No-projection branch (d_proj == d_embed): exact f32 gather path.
    emb_table2 = jax.random.normal(jax.random.PRNGKey(1), (64, 32), jnp.float32)
    emb_table2 = emb_table2.at[63].set(0.0)
    tokens2 = jax.random.randint(jax.random.PRNGKey(2), (batch, seq), 0, 64,
                                 dtype=jnp.int32)
    scale2 = 32 ** 0.5
    params2 = prepare_word_embedding_params(emb_table2, None, scale2)
    out2 = jax.block_until_ready(word_embedding_forward(tokens2, params2))
    ref2 = np.asarray(emb_table2)[np.asarray(tokens2)] * np.float32(scale2)
    assert out2.shape == (batch, seq, 32)
    np.testing.assert_allclose(np.asarray(out2), ref2, atol=1e-6, rtol=1e-6)

    print("KERNEL_OK")
</pallas_src>

<mosaic_0001>
module attributes {stable_mosaic.version = 11 : i64} {
  func.func @_vmem_onehot_proj_kernel(%arg0: i32, %arg1: memref<16x1xi32, #tpu.memory_space<vmem>>, %arg2: memref<100x128xbf16, #tpu.memory_space<vmem>>, %arg3: memref<128x128xbf16, #tpu.memory_space<vmem>>, %arg4: memref<16x128xf32, #tpu.memory_space<vmem>>) attributes {dimension_semantics = [#tpu.dimension_semantics<parallel>], iteration_bounds = array<i64: 1>, scalar_prefetch = 0 : i64, scratch_operands = 0 : i64, tpu.core_type = #tpu.core_type<tc>, window_params = [{transform_indices = @transform_0, window_bounds = array<i64: 16, 1>}, {pipeline_mode = #tpu.pipeline_mode<synchronous>, transform_indices = @transform_1, window_bounds = array<i64: 100, 128>}, {pipeline_mode = #tpu.pipeline_mode<synchronous>, transform_indices = @transform_2, window_bounds = array<i64: 128, 128>}, {transform_indices = @transform_3, window_bounds = array<i64: 16, 128>}]} {
    %c0 = arith.constant 0 : index
    %c0_0 = arith.constant 0 : index
    %0 = vector.load %arg1[%c0, %c0_0] : memref<16x1xi32, #tpu.memory_space<vmem>>, vector<16x1xi32>
    %1 = tpu.iota {dimensions = array<i32: 1>} : vector<16x100xi32>
    %2 = vector.broadcast %0 : vector<16x1xi32> to vector<16x100xi32>
    %3 = arith.cmpi eq, %2, %1 : vector<16x100xi32>
    %4 = arith.extui %3 : vector<16x100xi1> to vector<16x100xi32>
    %5 = arith.sitofp %4 : vector<16x100xi32> to vector<16x100xf32>
    %6 = arith.truncf %5 : vector<16x100xf32> to vector<16x100xbf16>
    %c0_1 = arith.constant 0 : index
    %c0_2 = arith.constant 0 : index
    %7 = vector.load %arg2[%c0_1, %c0_2] : memref<100x128xbf16, #tpu.memory_space<vmem>>, vector<100x128xbf16>
    %cst = arith.constant dense<0.000000e+00> : vector<16x128xf32>
    %8 = tpu.matmul %6, %7, %cst {dimension_numbers = #tpu.dot_dimension_numbers<[1], [0], [0], [1], [0, 0, 1, 1], [], []>} : vector<16x100xbf16>, vector<100x128xbf16>, vector<16x128xf32> -> vector<16x128xf32>
    %9 = arith.truncf %8 : vector<16x128xf32> to vector<16x128xbf16>
    %c0_3 = arith.constant 0 : index
    %c0_4 = arith.constant 0 : index
    %10 = vector.load %arg3[%c0_3, %c0_4] : memref<128x128xbf16, #tpu.memory_space<vmem>>, vector<128x128xbf16>
    %cst_5 = arith.constant dense<0.000000e+00> : vector<16x128xf32>
    %11 = tpu.matmul %9, %10, %cst_5 {dimension_numbers = #tpu.dot_dimension_numbers<[1], [0], [0], [1], [0, 0, 1, 1], [], []>} : vector<16x128xbf16>, vector<128x128xbf16>, vector<16x128xf32> -> vector<16x128xf32>
    %c0_6 = arith.constant 0 : index
    %c0_7 = arith.constant 0 : index
    %12 = vector.load %arg4[%c0_6, %c0_7] : memref<16x128xf32, #tpu.memory_space<vmem>>, vector<16x128xf32>
    tpu.vector_store %arg4[%c0_6, %c0_7], %11 {strides = array<i32>} : memref<16x128xf32, #tpu.memory_space<vmem>>, vector<16x128xf32>,
    return
  }
  func.func @transform_0(%arg0: i32) -> (i32, i32) {
    %c0_i32 = arith.constant 0 : i32
    %c0_i32_0 = arith.constant 0 : i32
    return %arg0, %c0_i32 : i32, i32
  }
  func.func @transform_1(%arg0: i32) -> (i32, i32) {
    %c0_i32 = arith.constant 0 : i32
    %c0_i32_0 = arith.constant 0 : i32
    %c0_i32_1 = arith.constant 0 : i32
    return %c0_i32, %c0_i32_0 : i32, i32
  }
  func.func @transform_2(%arg0: i32) -> (i32, i32) {
    %c0_i32 = arith.constant 0 : i32
    %c0_i32_0 = arith.constant 0 : i32
    %c0_i32_1 = arith.constant 0 : i32
    return %c0_i32, %c0_i32_0 : i32, i32
  }
  func.func @transform_3(%arg0: i32) -> (i32, i32) {
    %c0_i32 = arith.constant 0 : i32
    %c0_i32_0 = arith.constant 0 : i32
    return %arg0, %c0_i32 : i32, i32
  }
}

</mosaic_0001>

<bundles_post_ra>
// kernel: tpu_custom_call.1
= control target key start
LH: loop header
LB: loop body
LE: loop exit
PB: predicated region body
PF: predicated region fallthrough
CT: control target
= control target key end

     0   :  { %8 = vsyncpa [#allocation3], 0  ;;  %s498_s0 = inlined_call_operand.vmem [shape: s32[16,1], index: 0, kind: input, shape index: {}]   ;;  %s499_s1 = inlined_call_operand.hbm [shape: bf16[100,128], index: 1, kind: input, shape index: {}]   ;;  %s500_s2 = inlined_call_operand.hbm [shape: bf16[128,128], index: 2, kind: input, shape index: {}]   ;;  %s501_s3 = inlined_call_operand.hbm [shape: f32[16,128], index: 3, kind: output, shape index: {}]  }
   0x1   :  { %9 = vsyncpa [#allocation6], 0 }
   0x2   :  { %10 = vsyncpa [#allocation4], 0  ;;  %s453_s12 = smov [#allocation2]  }
   0x3   :  { %s18_s13 = sshll.u32 %s453_s12, 4  ;;  %s19_s13 = int_to_ptr.vmem [resolvable:$true] %s18_s13 }
   0x4   :  { %s395_s14 = scalar_lea.vmem %s19_s13, 832  ;;  %p400_p1 = scmp.lt.s32.totalorder %s19_s13, %s19_s13 }
   0x5   :  { %p396_p0 = scmp.ne.s32.totalorder %s19_s13, %s395_s14  ;;  %p401_p2 = scmp.lt.s32.totalorder %s395_s14, %s395_s14 }
   0x7   :  { %p402_p3 = por %p401_p2, %p400_p1 }
   0x9   :  { %p403_p4 = pnand %p402_p3, %p396_p0 }
   0xb   :  { %406 = shalt.err (!%p403_p4)
}
   0xc   :  { %s454_s15 = smov 64   ;;  %s455_s16 = smov 4  }
   0xd   :  { %24 = dma.hbm_to_vmem [thread:$0]  %s499_s1, 832, %s19_s13, [#allocation3], %s454_s15, %s454_s15, %s455_s16  }
   0xe   :  { %s456_s19 = smov [#allocation5]  }
   0xf   :  { %s30_s20 = sshll.u32 %s456_s19, 4  ;;  %s31_s20 = int_to_ptr.vmem [resolvable:$true] %s30_s20 }
  0x10   :  { %s415_s21 = scalar_lea.vmem %s31_s20, 1024  ;;  %p420_p6 = scmp.lt.s32.totalorder %s31_s20, %s31_s20 }
  0x11   :  { %p416_p5 = scmp.ne.s32.totalorder %s31_s20, %s415_s21  ;;  %p421_p7 = scmp.lt.s32.totalorder %s415_s21, %s415_s21 }
  0x13   :  { %p422_p8 = por %p421_p7, %p420_p6 }
  0x15   :  { %p423_p9 = pnand %p422_p8, %p416_p5 }
  0x17   :  { %426 = shalt.err (!%p423_p9)
}
  0x18   :  { %36 = dma.hbm_to_vmem [thread:$0]  %s500_s2, 1024, %s31_s20, [#allocation6], %s454_s15, %s454_s15, %s455_s16  }
  0x19   :  { %447 = dma.done.wait [#allocation3], 832  }
  0x1a   :  { %448 = vsyncadd [#allocation3], 4294966464 }
  0x1b   :  { %449 = dma.done.wait [#allocation6], 1024  }
  0x1c   :  { %450 = vsyncadd [#allocation6], 4294966272  ;;  %v457_v0 = vmov 0   ;;  %v458_v1 = vmov 0.0   ;;  %v44_v2 = vld [vmem:[%s498_s0] sm:$0xff]  ;;  %vm117_vm0 = vcmask 1041408   ;;  %v46_v18 = vlaneseq }
  0x1d   :  { %371 = vset.pattern.permute.xlu0 %v457_v0  ;;  %323 = vmatprep.subr.bf16.mxu0 %v458_v1  ;;  %v45_v3 = vld [vmem:[%s498_s0 + $0x8] sm:$0xff]  ;;  %v372_v4 = vld [vmem:[#allocation2 + $0x30] ss:$0 sps:$4 sm:$0x33]   ;;  %vm459_vm1 = vmmov 0   ;;  %v374_v7 = vld [vmem:[#allocation2 + $0x20] sm:$0xff]  }
  0x1e   :  { %341 = vmatprep.subr.bf16.mxu1 %v458_v1  ;;  %49 = vperm.xlu0 %371, %v44_v2   ;;  %v119_v5 = vsel %vm117_vm0, %v372_v4, 0  ;;  %v373_v6 = vld [vmem:[#allocation2 + $0x28] sm:$0xff]   ;;  %v375_v10 = vld [vmem:[#allocation2 + $0x18] sm:$0xff]   ;;  %v376_v12 = vld [vmem:[#allocation2 + $0x10] sm:$0xff]   ;;  %v47_v19 = vand.u32 127, %v46_v18  ;;  %vm113_vm4 = vcmask 818176  }
  0x1f   :  { %324 = vmatpush3.bf16.msra.mxu0 %v119_v5  ;;  %337 = vmatprep.mubr.msk.bf16.mxu0 %vm459_vm1, %v458_v1  ;;  %v379_v8 = vld [vmem:[#allocation5 + $0x38] sm:$0xff]   ;;  %v380_v9 = vld [vmem:[#allocation5 + $0x30] sm:$0xff]   ;;  %v381_v11 = vld [vmem:[#allocation5 + $0x28] sm:$0xff]   ;;  %s460_s0 = smov [#allocation7]  }
  0x20   :  { %325 = vmatprep.subr.bf16.mxu0 %v458_v1  ;;  %357 = vmatprep.mubr.msk.bf16.mxu1 %vm459_vm1, %v458_v1  ;;  %v382_v13 = vld [vmem:[#allocation5 + $0x20] sm:$0xff]   ;;  %v377_v14 = vld [vmem:[#allocation2 + $0x8] sm:$0xff]   ;;  %v378_v16 = vld [vmem:[#allocation2] sm:$0xff]   ;;  %s275_s2 = sshll.u32 %s460_s0, 4  ;;  %s276_s2 = int_to_ptr.vmem [resolvable:$true] %s275_s2 }
  0x21   :  { %342 = vmatpush3.bf16.msra.mxu1 %v379_v8  ;;  %v383_v15 = vld [vmem:[#allocation5 + $0x18] sm:$0xff]   ;;  %v384_v17 = vld [vmem:[#allocation5 + $0x10] sm:$0xff]   ;;  %v385_v25 = vld [vmem:[#allocation5 + $0x8] sm:$0xff]   ;;  %s427_s27 = scalar_lea.vmem %s276_s2, 256  ;;  %p432_p11 = scmp.lt.s32.totalorder %s276_s2, %s276_s2 }
  0x22   :  { %52 = vperm.xlu0 %371, %v45_v3   ;;  %343 = vmatprep.subr.bf16.mxu1 %v458_v1  ;;  %v386_v26 = vld [vmem:[#allocation5] sm:$0xff]   ;;  %p428_p10 = scmp.ne.s32.totalorder %s276_s2, %s427_s27  ;;  %p433_p12 = scmp.lt.s32.totalorder %s427_s27, %s427_s27 }
  0x23   :  { %326 = vmatpush3.bf16.msra.mxu0 %v373_v6 }
  0x24   :  { %327 = vmatprep.subr.bf16.mxu0 %v458_v1  ;;  %p434_p13 = por %p433_p12, %p432_p11 }
  0x25   :  { %344 = vmatpush3.bf16.msra.mxu1 %v380_v9 }
  0x26   :  { %345 = vmatprep.subr.bf16.mxu1 %v458_v1  ;;  %p435_p0 = pnand %p434_p13, %p428_p10 }
  0x27   :  { %328 = vmatpush3.bf16.msra.mxu0 %v374_v7 }
  0x28   :  { %329 = vmatprep.subr.bf16.mxu0 %v458_v1 }
  0x29   :  { %346 = vmatpush3.bf16.msra.mxu1 %v381_v11 }
  0x2a   :  { %347 = vmatprep.subr.bf16.mxu1 %v458_v1 }
  0x2b   :  { %330 = vmatpush3.bf16.msra.mxu0 %v375_v10 }
  0x2c   :  { %331 = vmatprep.subr.bf16.mxu0 %v458_v1 }
  0x2d   :  { %348 = vmatpush3.bf16.msra.mxu1 %v382_v13 }
  0x2e   :  { %349 = vmatprep.subr.bf16.mxu1 %v458_v1 }
  0x2f   :  { %332 = vmatpush3.bf16.msra.mxu0 %v376_v12 }
  0x30   :  { %333 = vmatprep.subr.bf16.mxu0 %v458_v1 }
  0x31   :  { %350 = vmatpush3.bf16.msra.mxu1 %v383_v15 }
  0x32   :  { %351 = vmatprep.subr.bf16.mxu1 %v458_v1 }
  0x33   :  { %334 = vmatpush3.bf16.msra.mxu0 %v377_v14 }
  0x34   :  { %335 = vmatprep.subr.bf16.mxu0 %v458_v1 }
  0x35   :  { %352 = vmatpush3.bf16.msra.mxu1 %v384_v17 }
  0x36   :  { %353 = vmatprep.subr.bf16.mxu1 %v458_v1 }
  0x37   :  { %336 = vmatpush3.bf16.msra.mxu0 %v378_v16 }
  0x39   :  { %354 = vmatpush3.bf16.msra.mxu1 %v385_v25 }
  0x3a   :  { %355 = vmatprep.subr.bf16.mxu1 %v458_v1 }
  0x3d   :  { %356 = vmatpush3.bf16.msra.mxu1 %v386_v26 }
  0x99   :  { %v50_v20 = vpop.permute.xlu0 %49 }
  0x9a   :  { %vm54_vm2 = vcmp.eq.s32.totalorder %v50_v20, %v47_v19 }
  0x9b   :  { %v288_v22 = vsel %vm54_vm2, 1.0, %v458_v1 }
  0x9d   :  { %v53_v21 = vpop.permute.xlu0 %52 }
  0x9e   :  { %vm55_vm3 = vcmp.eq.s32.totalorder %v53_v21, %v47_v19 }
  0x9f   :  { %v289_v23 = vsel %vm55_vm3, 1.0, %v458_v1 }
  0xa0   :  { %v60_v24 = vpack.c.bf16 %v289_v23, %v288_v22 }
  0xa2   :  { %338 = vmatmul.mubr.msk.bf16.vlgmr.msra.gmra.mxu0 %vm113_vm4, %v60_v24 }
 0x162   :  { %v155_v27 = vpop.f32.mrf.mxu0 }
 0x164   :  { %v339_v28 = vpop.f32.mrf.mxu0 }
 0x166   :  { %v158_v29 = vpop.f32.mrf.mxu0 }
 0x167   :  { %v162_v30 = vpack.c.bf16 %v158_v29, %v155_v27 }
 0x168   :  { %v340_v31 = vpop.f32.mrf.mxu0 }
 0x169   :  { %358 = vmatmul.mubr.bf16.vlgmr.msra.gmra.mxu1 %v162_v30 }
 0x229   :  { %v261_v32 = vpop.f32.mrf.mxu1 }
 0x22a   :  { %268 = vst [vmem:[#allocation7] sm:$0xff] %v261_v32 }
 0x22b   :  { %v359_v33 = vpop.f32.mrf.mxu1 }
 0x22d   :  { %v264_v34 = vpop.f32.mrf.mxu1 }
 0x22e   :  { %269 = vst [vmem:[#allocation7 + $0x8] sm:$0xff] %v264_v34 }
 0x22f   :  { %v360_v35 = vpop.f32.mrf.mxu1 }
 0x230   :  { %438 = shalt.err (!%p435_p0)
}
 0x231   :  { %s461_s28 = smov 128   ;;  %s462_s29 = smov 8  }
 0x232   :  { %281 = dma.vmem_to_hbm [thread:$0]  %s276_s2, 256, %s501_s3, [#allocation4], %s461_s28, %s461_s28, %s462_s29  }
 0x233   :  { %451 = dma.done.wait [#allocation4], 256  }
 0x234   :  { %452 = vsyncadd [#allocation4], 4294967040 }
 0x235   :  { %285 = vsyncpa [#allocation3], 1 }
 0x236   :  { %286 = vsyncpa [#allocation6], 1 }
 0x237   :  { %287 = vsyncpa [#allocation4], 1 }

</bundles_post_ra>
